<compile_context>
chip_gen: v7x
topology: tpu7x:2x2x1
jax: 0.10.0
libtpu: 0.0.40
codegen_flags: <defaults>
</compile_context>

<pallas_src>
import functools

import jax
import jax.numpy as jnp
from jax import lax
from jax.experimental import pallas as pl
from jax.experimental.pallas import tpu as pltpu


# VMEM accounting: per input-block element we budget
#   2 * dtype_bytes   (BlockSpec double-buffered input copies)
# + 4 bytes           (one f32 upcast / reduction temporary)
# and, on the multi-pass (huge H*W) branch, +8 bytes for iota/mask temps.
# The accounted footprint stays under _VMEM_BUDGET_BYTES; _VMEM_LIMIT_BYTES is
# handed to Mosaic (headroom for output, scratch, internal buffers) and stays
# well below v7x's 64 MiB physical VMEM.
_VMEM_BUDGET_BYTES = 24 * 1024 * 1024
_VMEM_LIMIT_BYTES = 48 * 1024 * 1024


def _round_up(x, m):
    return (x + m - 1) // m * m


def _pick_tiles(bc, hw, dtype_bytes, vmem_budget_bytes):
    """Choose (tile_bc, tile_hw) under the accounted VMEM budget."""
    sub = max(8, 32 // dtype_bytes)        # sublane packing granularity
    lane_hw = _round_up(hw, 128)           # VMEM lane-pads the minor dim to 128
    per_elem_1pass = 2 * dtype_bytes + 4   # double-buffered input + f32 temp
    row_bytes = lane_hw * per_elem_1pass

    if sub * row_bytes <= vmem_budget_bytes:
        # Common case: the full spatial extent fits in one block per row tile.
        tile_hw = hw
        tile_bc = max(sub, (vmem_budget_bytes // row_bytes) // sub * sub)
        tile_bc = min(tile_bc, _round_up(bc, sub))
        if pl.cdiv(bc, tile_bc) < 2 and tile_bc > sub:
            # v7x megacore: give the "parallel" row axis at least two steps.
            tile_bc = max(sub, _round_up(pl.cdiv(bc, 2), sub))
    else:
        # Huge spatial extent: also tile the reduction axis (multiples of 128).
        tile_bc = sub
        per_elem = per_elem_1pass + 8      # + iota/mask temporaries
        col_bytes = sub * per_elem
        tile_hw = max(128, (vmem_budget_bytes // col_bytes) // 128 * 128)
        tile_hw = min(tile_hw, lane_hw)
    return tile_bc, tile_hw


def _mil_mean_kernel(x_ref, o_ref, *, inv_hw):
    """Single pass: the whole H*W extent of this row block is in x_ref."""
    x = x_ref[...].astype(jnp.float32)
    o_ref[...] = (jnp.sum(x, axis=-1, keepdims=True) * inv_hw).astype(o_ref.dtype)


def _mil_mean_kernel_acc(x_ref, o_ref, acc_ref, *, inv_hw, hw, tile_hw):
    """Multi-pass over H*W with an f32 scratch accumulator (huge H*W only)."""
    k = pl.program_id(1)

    @pl.when(k == 0)
    def _():
        acc_ref[...] = jnp.zeros_like(acc_ref)

    x = x_ref[...].astype(jnp.float32)
    if hw % tile_hw != 0:
        # The last block along H*W runs past the array; its out-of-bounds
        # columns hold unspecified data and must not reach the sum.
        valid_cols = hw - k * tile_hw
        col = lax.broadcasted_iota(jnp.int32, x.shape, 1)
        x = jnp.where(col < valid_cols, x, 0.0)
    acc_ref[...] += jnp.sum(x, axis=-1, keepdims=True)

    @pl.when(k == pl.num_programs(1) - 1)
    def _():
        o_ref[...] = (acc_ref[...] * inv_hw).astype(o_ref.dtype)


def mil_forward(x, *, vmem_budget_bytes=_VMEM_BUDGET_BYTES):
    """MIL forward (mil_type == 2): spatial mean of an NCHW input -> (B, C)."""
    b, c, h, w = x.shape
    bc, hw = b * c, h * w
    x2d = x.reshape(bc, hw)   # free for contiguous NCHW: no HBM copy

    dtype_bytes = jnp.dtype(x.dtype).itemsize
    tile_bc, tile_hw = _pick_tiles(bc, hw, dtype_bytes, vmem_budget_bytes)

    n_bc = pl.cdiv(bc, tile_bc)
    n_hw = pl.cdiv(hw, tile_hw)
    out_rows = n_bc * tile_bc  # whole row blocks; tail rows discarded below
    out_shape = jax.ShapeDtypeStruct((out_rows, 1), x.dtype)
    inv_hw = 1.0 / hw

    if n_hw == 1:
        tile_hw = hw  # block minor dim == full array minor dim (no OOB columns)
        out2d = pl.pallas_call(
            functools.partial(_mil_mean_kernel, inv_hw=inv_hw),
            out_shape=out_shape,
            grid=(n_bc,),
            in_specs=[pl.BlockSpec((tile_bc, tile_hw), lambda i: (i, 0))],
            out_specs=pl.BlockSpec((tile_bc, 1), lambda i: (i, 0)),
            compiler_params=pltpu.CompilerParams(
                dimension_semantics=("parallel",),
                vmem_limit_bytes=_VMEM_LIMIT_BYTES),
        )(x2d)
    else:
        out2d = pl.pallas_call(
            functools.partial(_mil_mean_kernel_acc, inv_hw=inv_hw,
                              hw=hw, tile_hw=tile_hw),
            out_shape=out_shape,
            grid=(n_bc, n_hw),
            in_specs=[pl.BlockSpec((tile_bc, tile_hw), lambda i, k: (i, k))],
            out_specs=pl.BlockSpec((tile_bc, 1), lambda i, k: (i, 0)),
            scratch_shapes=[pltpu.VMEM((tile_bc, 1), jnp.float32)],
            compiler_params=pltpu.CompilerParams(
                dimension_semantics=("parallel", "arbitrary"),
                vmem_limit_bytes=_VMEM_LIMIT_BYTES),
        )(x2d)

    # Rows past `bc` come from the out-of-bounds tail of the last row block.
    return out2d[:bc, 0].reshape(b, c)


def mil_reference(x):
    # Pure-JAX reference mirroring torch: input.mean(3).mean(2)
    return x.mean(axis=3).mean(axis=2)


if __name__ == "__main__":
    key = jax.random.PRNGKey(0)
    k1, k2, k3 = jax.random.split(key, 3)

    # Primary test: small NCHW input (single-pass path, exact tiling).
    x = jax.random.uniform(k1, (2, 4, 16, 16), dtype=jnp.float32)
    out = jax.block_until_ready(mil_forward(x))
    ref = mil_reference(x)
    assert out.shape == (2, 4), out.shape
    assert jnp.allclose(out, ref, atol=1e-5, rtol=1e-5), "mismatch vs reference"

    # Ragged B*C tail: last row block runs out of bounds; rows sliced off.
    x2 = jax.random.uniform(k2, (2, 3, 7, 7), dtype=jnp.float32)
    out2 = jax.block_until_ready(mil_forward(x2))
    ref2 = mil_reference(x2)
    assert out2.shape == (2, 3), out2.shape
    assert jnp.allclose(out2, ref2, atol=1e-5, rtol=1e-5), "ragged B*C mismatch"

    # Force the multi-pass (tiled H*W) path with a tiny VMEM budget so the
    # ragged-tail column masking is exercised on a small input.
    x3 = jax.random.uniform(k3, (2, 4, 30, 40), dtype=jnp.float32)
    out3 = jax.block_until_ready(mil_forward(x3, vmem_budget_bytes=64 * 1024))
    ref3 = mil_reference(x3)
    assert out3.shape == (2, 4), out3.shape
    assert jnp.allclose(out3, ref3, atol=1e-5, rtol=1e-5), "tiled H*W mismatch"

    print("KERNEL_OK")
</pallas_src>

<mosaic_0001>
module attributes {stable_mosaic.version = 11 : i64} {
  func.func @_mil_mean_kernel(%arg0: i32, %arg1: memref<8x256xf32, #tpu.memory_space<vmem>>, %arg2: memref<8x1xf32, #tpu.memory_space<vmem>>) attributes {dimension_semantics = [#tpu.dimension_semantics<parallel>], iteration_bounds = array<i64: 1>, scalar_prefetch = 0 : i64, scratch_operands = 0 : i64, tpu.core_type = #tpu.core_type<tc>, window_params = [{transform_indices = @transform_0, window_bounds = array<i64: 8, 256>}, {transform_indices = @transform_1, window_bounds = array<i64: 8, 1>}]} {
    %c0 = arith.constant 0 : index
    %c0_0 = arith.constant 0 : index
    %0 = vector.load %arg1[%c0, %c0_0] : memref<8x256xf32, #tpu.memory_space<vmem>>, vector<8x256xf32>
    %cst = arith.constant dense<0.000000e+00> : vector<8xf32>
    %1 = vector.multi_reduction <add>, %0, %cst [1] : vector<8x256xf32> to vector<8xf32>
    %2 = vector.shape_cast %1 : vector<8xf32> to vector<8x1xf32>
    %cst_1 = arith.constant 3.906250e-03 : f32
    %3 = vector.broadcast %cst_1 : f32 to vector<8x1xf32>
    %4 = arith.mulf %2, %3 : vector<8x1xf32>
    %c0_2 = arith.constant 0 : index
    %c0_3 = arith.constant 0 : index
    %5 = vector.load %arg2[%c0_2, %c0_3] : memref<8x1xf32, #tpu.memory_space<vmem>>, vector<8x1xf32>
    tpu.vector_store %arg2[%c0_2, %c0_3], %4 {strides = array<i32>} : memref<8x1xf32, #tpu.memory_space<vmem>>, vector<8x1xf32>,
    return
  }
  func.func @transform_0(%arg0: i32) -> (i32, i32) {
    %c0_i32 = arith.constant 0 : i32
    %c0_i32_0 = arith.constant 0 : i32
    return %arg0, %c0_i32 : i32, i32
  }
  func.func @transform_1(%arg0: i32) -> (i32, i32) {
    %c0_i32 = arith.constant 0 : i32
    %c0_i32_0 = arith.constant 0 : i32
    return %arg0, %c0_i32 : i32, i32
  }
}

</mosaic_0001>

<bundles_post_ra>
// kernel: tpu_custom_call.1
= control target key start
LH: loop header
LB: loop body
LE: loop exit
PB: predicated region body
PF: predicated region fallthrough
CT: control target
= control target key end

     0   :  { %6 = vsyncpa [#allocation3], 0  ;;  %s58_s6 = smov [#allocation2]   ;;  %s84_s0 = inlined_call_operand.hbm [shape: f32[8,256], index: 0, kind: input, shape index: {}]   ;;  %s85_s1 = inlined_call_operand.vmem [shape: f32[8,1], index: 1, kind: output, shape index: {}]  }
   0x1   :  { %s13_s7 = sshll.u32 %s58_s6, 4  ;;  %s34_s10 = scalar_lea.hbm %s84_s0, 256  ;;  %s14_s7 = int_to_ptr.vmem [resolvable:$true] %s13_s7 }
   0x2   :  { %p35_p0 = scmp.ne.s32.totalorder %s84_s0, %s34_s10  ;;  %p38_p1 = scmp.lt.u32.totalorder %s34_s10, %s84_s0 }
   0x4   :  { %p40_p2 = pnand %p38_p1, %p35_p0 }
   0x6   :  { %43 = shalt.err (!%p40_p2)
}
   0x7   :  { %s44_s15 = scalar_lea.vmem %s14_s7, 256  ;;  %p49_p4 = scmp.lt.s32.totalorder %s14_s7, %s14_s7 }
   0x8   :  { %p45_p3 = scmp.ne.s32.totalorder %s14_s7, %s44_s15  ;;  %p50_p5 = scmp.lt.s32.totalorder %s44_s15, %s44_s15 }
   0xa   :  { %p51_p6 = por %p50_p5, %p49_p4 }
   0xc   :  { %p52_p7 = pnand %p51_p6, %p45_p3 }
   0xe   :  { %55 = shalt.err (!%p52_p7)
}
   0xf   :  { %16 = dma.hbm_to_vmem [thread:$0]  %s84_s0, 256, %s14_s7, [#allocation3]  }
  0x10   :  { %56 = dma.done.wait [#allocation3], 256  }
  0x11   :  { %57 = vsyncadd [#allocation3], 4294967040  ;;  %v20_v0 = vld [vmem:[#allocation2] sm:$0xff]  ;;  %v21_v1 = vld [vmem:[#allocation2 + $0x8] sm:$0xff]  ;;  %vm26_vm0 = vcmask 7168  }
  0x12   :  { %v22_v2 = vadd.f32 %v21_v1, %v20_v0 }
  0x14   :  { %23 = vadd.xlane.f32.xlu0 %v22_v2 }
  0xa1   :  { %v24_v3 = vpop.xlane.xlu0 %23 }
  0xa2   :  { %v25_v4 = vmul.f32 0.00390625, %v24_v3 }
  0xa4   :  { %27 = vst.msk [vmem:[%s85_s1] sm:$0xff] %vm26_vm0, %v25_v4 }
  0xa5   :  { %32 = vsyncpa [#allocation3], 1 }

</bundles_post_ra>
